<compile_context>
chip_gen: v6e
topology: v6e:2x2x1
jax: 0.10.0
libtpu: 0.0.40
codegen_flags: <defaults>
</compile_context>

<pallas_src>
import functools

import jax
import jax.numpy as jnp
from jax.experimental import pallas as pl
from jax.experimental.pallas import tpu as pltpu

HEADS = 5
LANE = 128  # TPU lane width; fc3 output is padded to this for lane-dense stores.


# ---------------------------------------------------------------------------
# Kernel: relu(x@M + c) -> relu(.@W2 + b2) -> .@W3p + b3p -> softmax(dim=0)
# ---------------------------------------------------------------------------
def policy_net_kernel(x_ref, m_ref, c_ref, w2_ref, b2_ref, w3_ref, b3_ref,
                      out_ref):
    x = x_ref[...]                                                   # (B, D)

    h1 = jnp.maximum(
        jnp.dot(x, m_ref[...], preferred_element_type=jnp.float32)
        + c_ref[...], 0.0)                                           # (B, 128)
    h2 = jnp.maximum(
        jnp.dot(h1, w2_ref[...], preferred_element_type=jnp.float32)
        + b2_ref[...], 0.0)                                          # (B, 256)
    logits = (jnp.dot(h2, w3_ref[...], preferred_element_type=jnp.float32)
              + b3_ref[...])                                         # (B, A_pad)

    # F.softmax(..., dim=0): normalize over the BATCH axis, exactly as in the
    # PyTorch reference. Padded columns (zero weights/bias) are sliced off
    # outside the kernel.
    m = jnp.max(logits, axis=0, keepdims=True)
    ez = jnp.exp(logits - m)
    out_ref[...] = ez * pl.reciprocal(jnp.sum(ez, axis=0, keepdims=True),
                                      approx=False)


# ---------------------------------------------------------------------------
# Parameter init (PyTorch-style uniform +-1/sqrt(fan_in), PyTorch layout).
# ---------------------------------------------------------------------------
def init_params(key, state_dim, action_dim):
    head_dim = state_dim // HEADS
    dh = HEADS * head_dim

    def linear(k, fan_in, fan_out, bias):
        kw, kb = jax.random.split(k)
        bound = 1.0 / (fan_in ** 0.5)
        w = jax.random.uniform(kw, (fan_out, fan_in), jnp.float32, -bound, bound)
        b = (jax.random.uniform(kb, (1, fan_out), jnp.float32, -bound, bound)
             if bias else None)
        return w, b

    keys = jax.random.split(key, 7)
    wv, _ = linear(keys[0], state_dim, dh, bias=False)
    wk, _ = linear(keys[1], state_dim, dh, bias=False)   # only used by the reference
    wq, _ = linear(keys[2], state_dim, dh, bias=False)   # only used by the reference
    wo, bo = linear(keys[3], dh, state_dim, bias=True)
    w1, b1 = linear(keys[4], state_dim, 128, bias=True)
    w2, b2 = linear(keys[5], 128, 256, bias=True)
    w3, b3 = linear(keys[6], 256, action_dim, bias=True)

    return dict(wq=wq, wk=wk, wv=wv, wo=wo, bo=bo,
                w1=w1, b1=b1, w2=w2, b2=b2, w3=w3, b3=b3)


def fuse_params(params, action_dim):
    """One-time host-side weight prep.

    Folds the (seq_len==1 => identity-softmax) attention into fc1 and
    pre-transposes everything to (in_features, out_features); pads the fc3
    output dimension to a full 128-lane vreg for lane-dense stores.
    """
    wv, wo, bo = params["wv"], params["wo"], params["bo"]
    w1, b1 = params["w1"], params["b1"]

    M = (wv.T @ wo.T @ w1.T).astype(jnp.float32)        # (D, 128)
    c = (bo @ w1.T + b1).astype(jnp.float32)            # (1, 128)

    w2t = params["w2"].T.astype(jnp.float32)            # (128, 256)
    b2 = params["b2"].astype(jnp.float32)               # (1, 256)

    w3t = params["w3"].T.astype(jnp.float32)            # (256, A)
    b3 = params["b3"].astype(jnp.float32)               # (1, A)
    a_pad = max(LANE, ((action_dim + LANE - 1) // LANE) * LANE)
    w3p = jnp.zeros((w3t.shape[0], a_pad), jnp.float32).at[:, :action_dim].set(w3t)
    b3p = jnp.zeros((1, a_pad), jnp.float32).at[:, :action_dim].set(b3)

    return dict(M=M, c=c, w2t=w2t, b2=b2, w3p=w3p, b3p=b3p)


# ---------------------------------------------------------------------------
# Forward wrapper.
# ---------------------------------------------------------------------------
@functools.partial(jax.jit, static_argnames=("action_dim",))
def policy_net_forward(x, fused, action_dim):
    B = x.shape[0]
    a_pad = fused["w3p"].shape[1]
    vmem = pl.BlockSpec(memory_space=pltpu.MemorySpace.VMEM)

    out_padded = pl.pallas_call(
        policy_net_kernel,
        out_shape=jax.ShapeDtypeStruct((B, a_pad), jnp.float32),
        in_specs=[vmem] * 7,
        out_specs=vmem,
        compiler_params=pltpu.CompilerParams(vmem_limit_bytes=32 * 1024 * 1024),
    )(x.astype(jnp.float32), fused["M"], fused["c"], fused["w2t"], fused["b2"],
      fused["w3p"], fused["b3p"])

    return out_padded[:, :action_dim]


# ---------------------------------------------------------------------------
# Pure-JAX reference of the ORIGINAL PyTorch forward (incl. the full attention
# path with its mathematically-dead softmax), used to verify the fused kernel.
# ---------------------------------------------------------------------------
def reference_forward(x, params, state_dim, action_dim):
    head_dim = state_dim // HEADS
    B = x.shape[0]
    v = (x @ params["wv"].T).reshape(B, 1, HEADS, head_dim)
    k = (x @ params["wk"].T).reshape(B, 1, HEADS, head_dim)
    q = (x @ params["wq"].T).reshape(B, 1, HEADS, head_dim)
    energy = jnp.einsum("nqhd,nkhd->nhqk", q, k)
    attn = jax.nn.softmax(energy / state_dim ** 0.5, axis=3)
    att = jnp.einsum("nhql,nlhd->nqhd", attn, v).reshape(B, HEADS * head_dim)
    att_out = att @ params["wo"].T + params["bo"]
    h1 = jax.nn.relu(att_out @ params["w1"].T + params["b1"])
    h2 = jax.nn.relu(h1 @ params["w2"].T + params["b2"])
    logits = h2 @ params["w3"].T + params["b3"]
    return jax.nn.softmax(logits, axis=0)


if __name__ == "__main__":
    B = 8
    STATE_DIM = 20      # divisible by heads=5 -> head_dim=4
    ACTION_DIM = 5

    key = jax.random.PRNGKey(0)
    k_x, k_p = jax.random.split(key)
    x = jax.random.normal(k_x, (B, STATE_DIM), jnp.float32)

    params = init_params(k_p, STATE_DIM, ACTION_DIM)
    fused = fuse_params(params, ACTION_DIM)          # one-time host-side prep

    out = policy_net_forward(x, fused, ACTION_DIM)
    out = jax.block_until_ready(out)

    # Verify against the full (un-fused) reference forward.
    ref = reference_forward(x, params, STATE_DIM, ACTION_DIM)
    assert out.shape == (B, ACTION_DIM)
    assert bool(jnp.all(jnp.abs(out - ref) < 1e-5))

    # softmax over dim=0 -> each action column sums to 1 across the batch.
    col_sums = jnp.sum(out, axis=0)
    assert bool(jnp.all(jnp.abs(col_sums - 1.0) < 1e-5))

    print("KERNEL_OK")
</pallas_src>

<mosaic_0001>
module attributes {stable_mosaic.version = 11 : i64} {
  func.func @policy_net_kernel(%arg0: memref<8x20xf32, #tpu.memory_space<vmem>>, %arg1: memref<20x128xf32, #tpu.memory_space<vmem>>, %arg2: memref<1x128xf32, #tpu.memory_space<vmem>>, %arg3: memref<128x256xf32, #tpu.memory_space<vmem>>, %arg4: memref<1x256xf32, #tpu.memory_space<vmem>>, %arg5: memref<256x128xf32, #tpu.memory_space<vmem>>, %arg6: memref<1x128xf32, #tpu.memory_space<vmem>>, %arg7: memref<8x128xf32, #tpu.memory_space<vmem>>) attributes {dimension_semantics = [], scalar_prefetch = 0 : i64, scratch_operands = 0 : i64, tpu.core_type = #tpu.core_type<tc>} {
    %c0 = arith.constant 0 : index
    %c0_0 = arith.constant 0 : index
    %0 = vector.load %arg0[%c0, %c0_0] : memref<8x20xf32, #tpu.memory_space<vmem>>, vector<8x20xf32>
    %c0_1 = arith.constant 0 : index
    %c0_2 = arith.constant 0 : index
    %1 = vector.load %arg1[%c0_1, %c0_2] : memref<20x128xf32, #tpu.memory_space<vmem>>, vector<20x128xf32>
    %cst = arith.constant dense<0.000000e+00> : vector<8x128xf32>
    %2 = tpu.matmul %0, %1, %cst {dimension_numbers = #tpu.dot_dimension_numbers<[1], [0], [0], [1], [0, 0, 1, 1], [], []>} : vector<8x20xf32>, vector<20x128xf32>, vector<8x128xf32> -> vector<8x128xf32>
    %c0_3 = arith.constant 0 : index
    %c0_4 = arith.constant 0 : index
    %3 = vector.load %arg2[%c0_3, %c0_4] : memref<1x128xf32, #tpu.memory_space<vmem>>, vector<1x128xf32>
    %4 = vector.broadcast %3 : vector<1x128xf32> to vector<8x128xf32>
    %5 = arith.addf %2, %4 : vector<8x128xf32>
    %cst_5 = arith.constant 0.000000e+00 : f32
    %6 = vector.broadcast %cst_5 : f32 to vector<8x128xf32>
    %7 = arith.maximumf %5, %6 : vector<8x128xf32>
    %c0_6 = arith.constant 0 : index
    %c0_7 = arith.constant 0 : index
    %8 = vector.load %arg3[%c0_6, %c0_7] : memref<128x256xf32, #tpu.memory_space<vmem>>, vector<128x256xf32>
    %cst_8 = arith.constant dense<0.000000e+00> : vector<8x256xf32>
    %9 = tpu.matmul %7, %8, %cst_8 {dimension_numbers = #tpu.dot_dimension_numbers<[1], [0], [0], [1], [0, 0, 1, 1], [], []>} : vector<8x128xf32>, vector<128x256xf32>, vector<8x256xf32> -> vector<8x256xf32>
    %c0_9 = arith.constant 0 : index
    %c0_10 = arith.constant 0 : index
    %10 = vector.load %arg4[%c0_9, %c0_10] : memref<1x256xf32, #tpu.memory_space<vmem>>, vector<1x256xf32>
    %11 = vector.broadcast %10 : vector<1x256xf32> to vector<8x256xf32>
    %12 = arith.addf %9, %11 : vector<8x256xf32>
    %cst_11 = arith.constant 0.000000e+00 : f32
    %13 = vector.broadcast %cst_11 : f32 to vector<8x256xf32>
    %14 = arith.maximumf %12, %13 : vector<8x256xf32>
    %c0_12 = arith.constant 0 : index
    %c0_13 = arith.constant 0 : index
    %15 = vector.load %arg5[%c0_12, %c0_13] : memref<256x128xf32, #tpu.memory_space<vmem>>, vector<256x128xf32>
    %cst_14 = arith.constant dense<0.000000e+00> : vector<8x128xf32>
    %16 = tpu.matmul %14, %15, %cst_14 {dimension_numbers = #tpu.dot_dimension_numbers<[1], [0], [0], [1], [0, 0, 1, 1], [], []>} : vector<8x256xf32>, vector<256x128xf32>, vector<8x128xf32> -> vector<8x128xf32>
    %c0_15 = arith.constant 0 : index
    %c0_16 = arith.constant 0 : index
    %17 = vector.load %arg6[%c0_15, %c0_16] : memref<1x128xf32, #tpu.memory_space<vmem>>, vector<1x128xf32>
    %18 = vector.broadcast %17 : vector<1x128xf32> to vector<8x128xf32>
    %19 = arith.addf %16, %18 : vector<8x128xf32>
    %cst_17 = arith.constant dense<0xFF800000> : vector<128xf32>
    %20 = vector.multi_reduction <maximumf>, %19, %cst_17 [0] : vector<8x128xf32> to vector<128xf32>
    %21 = vector.shape_cast %20 : vector<128xf32> to vector<1x128xf32>
    %22 = vector.broadcast %21 : vector<1x128xf32> to vector<8x128xf32>
    %23 = arith.subf %19, %22 : vector<8x128xf32>
    %24 = math.exp %23 : vector<8x128xf32>
    %cst_18 = arith.constant dense<0.000000e+00> : vector<128xf32>
    %25 = vector.multi_reduction <add>, %24, %cst_18 [0] : vector<8x128xf32> to vector<128xf32>
    %26 = vector.shape_cast %25 : vector<128xf32> to vector<1x128xf32>
    %27 = tpu.reciprocal %26 : vector<1x128xf32> -> vector<1x128xf32>
    %28 = vector.broadcast %27 : vector<1x128xf32> to vector<8x128xf32>
    %29 = arith.mulf %24, %28 : vector<8x128xf32>
    %c0_19 = arith.constant 0 : index
    %c0_20 = arith.constant 0 : index
    %30 = vector.load %arg7[%c0_19, %c0_20] : memref<8x128xf32, #tpu.memory_space<vmem>>, vector<8x128xf32>
    tpu.vector_store %arg7[%c0_19, %c0_20], %29 {strides = array<i32>} : memref<8x128xf32, #tpu.memory_space<vmem>>, vector<8x128xf32>,
    return
  }
}

</mosaic_0001>

<bundles_post_ra>
// kernel: policy_net_forward.1
= control target key start
LH: loop header
LB: loop body
LE: loop exit
PB: predicated region body
PF: predicated region fallthrough
CT: control target
= control target key end

     0   :  { %12 = vsyncpa [#allocation3], 0  ;;  %s687_s0 = inlined_call_operand.hbm [shape: f32[8,20], index: 0, kind: input, shape index: {}]   ;;  %s688_s1 = inlined_call_operand.hbm [shape: f32[20,128], index: 1, kind: input, shape index: {}]   ;;  %s689_s2 = inlined_call_operand.vmem [shape: f32[1,128], index: 2, kind: input, shape index: {}]   ;;  %s690_s3 = inlined_call_operand.hbm [shape: f32[128,256], index: 3, kind: input, shape index: {}]   ;;  %s691_s4 = inlined_call_operand.vmem [shape: f32[1,256], index: 4, kind: input, shape index: {}]   ;;  %s692_s5 = inlined_call_operand.hbm [shape: f32[256,128], index: 5, kind: input, shape index: {}]   ;;  %s693_s6 = inlined_call_operand.vmem [shape: f32[1,128], index: 6, kind: input, shape index: {}]   ;;  %s694_s7 = inlined_call_operand.hbm [shape: f32[8,128], index: 7, kind: output, shape index: {}]  }
   0x1   :  { %13 = vsyncpa [#allocation6], 0 }
   0x2   :  { %14 = vsyncpa [#allocation9], 0 }
   0x3   :  { %15 = vsyncpa [#allocation4], 0  ;;  %s606_s24 = smov [#allocation5]  }
   0x4   :  { %s31_s25 = sshll.u32 %s606_s24, 4  ;;  %s32_s25 = int_to_ptr.vmem [resolvable:$true] %s31_s25 }
   0x5   :  { %s506_s26 = scalar_lea.vmem %s32_s25, 384  ;;  %p511_p1 = scmp.lt.s32.totalorder %s32_s25, %s32_s25 }
   0x6   :  { %p507_p0 = scmp.ne.s32.totalorder %s32_s25, %s506_s26  ;;  %p512_p2 = scmp.lt.s32.totalorder %s506_s26, %s506_s26 }
   0x8   :  { %p513_p3 = por %p512_p2, %p511_p1 }
   0xa   :  { %p514_p4 = pnand %p513_p3, %p507_p0 }
   0xc   :  { %517 = shalt.err (!%p514_p4)
}
   0xd   :  { %s607_s27 = smov 128   ;;  %s608_s28 = smov 8  }
   0xe   :  { %37 = dma.hbm_to_vmem [thread:$0]  %s688_s1, 384, %s32_s25, [#allocation6], %s607_s27, %s607_s27, %s608_s28  }
   0xf   :  { %s609_s8 = smov [#allocation2]   ;;  %s610_s10 = smov [#allocation7]  }
  0x10   :  { %s22_s9 = sshll.u32 %s609_s8, 4  ;;  %s45_s11 = sshll.u32 %s610_s10, 4  ;;  %s23_s9 = int_to_ptr.vmem [resolvable:$true] %s22_s9  ;;  %s46_s11 = int_to_ptr.vmem [resolvable:$true] %s45_s11 }
  0x11   :  { %s526_s12 = scalar_lea.vmem %s23_s9, 128  ;;  %p531_p6 = scmp.lt.s32.totalorder %s23_s9, %s23_s9 }
  0x12   :  { %p527_p5 = scmp.ne.s32.totalorder %s23_s9, %s526_s12  ;;  %p532_p7 = scmp.lt.s32.totalorder %s526_s12, %s526_s12 }
  0x14   :  { %p533_p8 = por %p532_p7, %p531_p6 }
  0x16   :  { %p534_p9 = pnand %p533_p8, %p527_p5 }
  0x18   :  { %537 = shalt.err (!%p534_p9)
}
  0x19   :  { %25 = dma.hbm_to_vmem [thread:$0]  %s687_s0, 128, %s23_s9, [#allocation3]  }
  0x1a   :  { %s546_s15 = scalar_lea.vmem %s46_s11, 4096  ;;  %p551_p11 = scmp.lt.s32.totalorder %s46_s11, %s46_s11 }
  0x1b   :  { %p547_p10 = scmp.ne.s32.totalorder %s46_s11, %s546_s15  ;;  %p552_p12 = scmp.lt.s32.totalorder %s546_s15, %s546_s15 }
  0x1d   :  { %p553_p13 = por %p552_p12, %p551_p11 }
  0x1f   :  { %p554_p0 = pnand %p553_p13, %p547_p10 }
  0x21   :  { %557 = shalt.err (!%p554_p0)
}
  0x22   :  { %s611_s1 = smov 256   ;;  %s612_s16 = smov 16  }
  0x23   :  { %51 = dma.hbm_to_vmem [thread:$0]  %s690_s3, 4096, %s46_s11, [#allocation6], %s611_s1, %s611_s1, %s612_s16  }
  0x24   :  { %s613_s19 = smov [#allocation8]  }
  0x25   :  { %s59_s20 = sshll.u32 %s613_s19, 4  ;;  %s60_s20 = int_to_ptr.vmem [resolvable:$true] %s59_s20 }
  0x26   :  { %s566_s21 = scalar_lea.vmem %s60_s20, 4096  ;;  %p571_p2 = scmp.lt.s32.totalorder %s60_s20, %s60_s20 }
  0x27   :  { %p567_p1 = scmp.ne.s32.totalorder %s60_s20, %s566_s21  ;;  %p572_p3 = scmp.lt.s32.totalorder %s566_s21, %s566_s21 }
  0x29   :  { %p573_p4 = por %p572_p3, %p571_p2 }
  0x2b   :  { %p574_p5 = pnand %p573_p4, %p567_p1 }
  0x2d   :  { %577 = shalt.err (!%p574_p5)
}
  0x2e   :  { %65 = dma.hbm_to_vmem [thread:$0]  %s692_s5, 4096, %s60_s20, [#allocation9], %s607_s27, %s607_s27, %s608_s28  }
  0x2f   :  { %598 = dma.done.wait [#allocation3], 128  }
  0x30   :  { %599 = vsyncadd [#allocation3], 4294967168 }
  0x31   :  { %600 = dma.done.wait [#allocation6], 4480  }
  0x32   :  { %601 = vsyncadd [#allocation6], 4294962816 }
  0x33   :  { %602 = dma.done.wait [#allocation9], 4096  }
  0x34   :  { %603 = vsyncadd [#allocation9], 4294963200  ;;  %v614_v0 = vmov 0.0   ;;  %vm615_vm0 = vmmov 0   ;;  %vm95_vm1 = vcmask 1043456   ;;  %v82_v2 = vld [vmem:[#allocation5 + $0x8] sm:$0xff] }
  0x35   :  { %474 = vmatprep.subr.mxu0 %v614_v0  ;;  %480 = vmatprep.mubr.msk.f32.mxu0 %vm615_vm0, %v614_v0  ;;  %v83_v1 = vld [vmem:[#allocation5 + $0x10] sm:$0xf]  ;;  %v200_v4 = vld [vmem:[#allocation7 + $0xf0] sm:$0xff]  ;;  %v81_v5 = vld [vmem:[#allocation5] sm:$0xff]  ;;  %vm91_vm2 = vcmask 162816  }
  0x36   :  { %278 = vmatprep.mubr.f32.mxu1 %v614_v0  ;;  %475 = vmatpush3.msk.msra.mxu0 %vm95_vm1, %v83_v1  ;;  %v201_v3 = vld [vmem:[#allocation7 + $0xf8] sm:$0xff]  ;;  %v199_v6 = vld [vmem:[#allocation7 + $0xe8] sm:$0xff]  ;;  %v198_v7 = vld [vmem:[#allocation7 + $0xe0] sm:$0xff] }
  0x37   :  { %476 = vmatprep.subr.mxu0 %v614_v0  ;;  %214 = vmatprep.subr.mxu1 %v201_v3  ;;  %v80_v8 = vld [vmem:[#allocation2] sm:$0xff]  ;;  %v197_v9 = vld [vmem:[#allocation7 + $0xd8] sm:$0xff]  ;;  %v196_v10 = vld [vmem:[#allocation7 + $0xd0] sm:$0xff] }
  0x38   :  { %477 = vmatpush3.msra.mxu0 %v82_v2  ;;  %215 = vmatpush1.msra.mxu1 %v200_v4  ;;  %v195_v11 = vld [vmem:[#allocation7 + $0xc8] sm:$0xff]  ;;  %v194_v12 = vld [vmem:[#allocation7 + $0xc0] sm:$0xff]  ;;  %v193_v13 = vld [vmem:[#allocation7 + $0xb8] sm:$0xff] }
  0x39   :  { %478 = vmatprep.subr.mxu0 %v614_v0  ;;  %216 = vmatprep.subr.mxu1 %v199_v6  ;;  %v192_v14 = vld [vmem:[#allocation7 + $0xb0] sm:$0xff]  ;;  %v191_v15 = vld [vmem:[#allocation7 + $0xa8] sm:$0xff]  ;;  %v190_v16 = vld [vmem:[#allocation7 + $0xa0] sm:$0xff] }
  0x3a   :  { %479 = vmatpush3.msra.mxu0 %v81_v5  ;;  %217 = vmatpush1.msra.mxu1 %v198_v7  ;;  %v189_v17 = vld [vmem:[#allocation7 + $0x98] sm:$0xff]  ;;  %v188_v18 = vld [vmem:[#allocation7 + $0x90] sm:$0xff]  ;;  %v187_v19 = vld [vmem:[#allocation7 + $0x88] sm:$0xff] }
  0x3b   :  { %481 = vmatmul.mubr.msk.f32.vlgmr.msra.gmra.mxu0 %vm91_vm2, %v80_v8  ;;  %218 = vmatprep.subr.mxu1 %v197_v9  ;;  %v186_v20 = vld [vmem:[#allocation7 + $0x80] sm:$0xff]  ;;  %v185_v21 = vld [vmem:[#allocation7 + $0x78] sm:$0xff]  ;;  %v184_v22 = vld [vmem:[#allocation7 + $0x70] sm:$0xff] }
  0x3c   :  { %219 = vmatpush1.msra.mxu1 %v196_v10  ;;  %v183_v23 = vld [vmem:[#allocation7 + $0x68] sm:$0xff]  ;;  %v182_v24 = vld [vmem:[#allocation7 + $0x60] sm:$0xff]  ;;  %v181_v25 = vld [vmem:[#allocation7 + $0x58] sm:$0xff]  ;;  %v204_v10 = vlaneseq }
  0x3d   :  { %220 = vmatprep.subr.mxu1 %v195_v11  ;;  %v180_v26 = vld [vmem:[#allocation7 + $0x50] sm:$0xff]  ;;  %v179_v27 = vld [vmem:[#allocation7 + $0x48] sm:$0xff]  ;;  %v178_v28 = vld [vmem:[#allocation7 + $0x40] sm:$0xff] }
  0x3e   :  { %221 = vmatpush1.msra.mxu1 %v194_v12  ;;  %v177_v29 = vld [vmem:[#allocation7 + $0x38] sm:$0xff]  ;;  %v176_v30 = vld [vmem:[#allocation7 + $0x30] sm:$0xff]  ;;  %v175_v31 = vld [vmem:[#allocation7 + $0x28] sm:$0xff]  ;;  %v205_v11 = vshrl.u32 %v204_v10, 7 }
  0x3f   :  { %222 = vmatprep.subr.mxu1 %v193_v13  ;;  %v174_v32 = vld [vmem:[#allocation7 + $0x20] sm:$0xff]  ;;  %v173_v33 = vld [vmem:[#allocation7 + $0x18] sm:$0xff]  ;;  %v172_v34 = vld [vmem:[#allocation7 + $0x10] sm:$0xff] }
  0x40   :  { %223 = vmatpush1.msra.mxu1 %v192_v14  ;;  %v171_v35 = vld [vmem:[#allocation7 + $0x8] sm:$0xff]  ;;  %v170_v36 = vld [vmem:[#allocation7] sm:$0xff]  ;;  %v318_v37 = vld [vmem:[#allocation8 + $0xf8] sm:$0xff]  ;;  %v206_v12 = vsub.s32 0, %v205_v11  ;;  %v210_v14 = vsub.s32 1, %v205_v11 }
  0x41   :  { %224 = vmatprep.subr.mxu1 %v191_v15  ;;  %v302_v38 = vld [vmem:[#allocation8 + $0x78] sm:$0xff]  ;;  %v317_v39 = vld [vmem:[#allocation8 + $0xf0] sm:$0xff]  ;;  %439 = vmatprep.subr.mxu0 %v318_v37  ;;  %v316_v41 = vld [vmem:[#allocation8 + $0xe8] sm:$0xff] }
  0x42   :  { %225 = vmatpush1.msra.mxu1 %v190_v16  ;;  %v301_v40 = vld [vmem:[#allocation8 + $0x70] sm:$0xff]  ;;  %440 = vmatpush3.msra.mxu0 %v302_v38  ;;  %v300_v42 = vld [vmem:[#allocation8 + $0x68] sm:$0xff]  ;;  %v315_v43 = vld [vmem:[#allocation8 + $0xe0] sm:$0xff] }
  0x43   :  { %226 = vmatprep.subr.mxu1 %v189_v17  ;;  %441 = vmatprep.subr.mxu0 %v317_v39  ;;  %v299_v44 = vld [vmem:[#allocation8 + $0x60] sm:$0xff]  ;;  %v314_v45 = vld [vmem:[#allocation8 + $0xd8] sm:$0xff]  ;;  %v313_v47 = vld [vmem:[#allocation8 + $0xd0] sm:$0xff] }
  0x44   :  { %227 = vmatpush1.msra.mxu1 %v188_v18  ;;  %442 = vmatpush3.msra.mxu0 %v301_v40  ;;  %v298_v46 = vld [vmem:[#allocation8 + $0x58] sm:$0xff]  ;;  %v297_v48 = vld [vmem:[#allocation8 + $0x50] sm:$0xff]  ;;  %v312_v49 = vld [vmem:[#allocation8 + $0xc8] sm:$0xff] }
  0x45   :  { %228 = vmatprep.subr.mxu1 %v187_v19  ;;  %443 = vmatprep.subr.mxu0 %v316_v41  ;;  %v296_v50 = vld [vmem:[#allocation8 + $0x48] sm:$0xff]  ;;  %v311_v51 = vld [vmem:[#allocation8 + $0xc0] sm:$0xff]  ;;  %v310_v53 = vld [vmem:[#allocation8 + $0xb8] sm:$0xff] }
  0x46   :  { %229 = vmatpush1.msra.mxu1 %v186_v20  ;;  %444 = vmatpush3.msra.mxu0 %v300_v42  ;;  %v295_v52 = vld [vmem:[#allocation8 + $0x40] sm:$0xff]  ;;  %v294_v54 = vld [vmem:[#allocation8 + $0x38] sm:$0xff]  ;;  %v309_v55 = vld [vmem:[#allocation8 + $0xb0] sm:$0xff] }
  0x47   :  { %230 = vmatprep.subr.mxu1 %v185_v21  ;;  %445 = vmatprep.subr.mxu0 %v315_v43  ;;  %v293_v56 = vld [vmem:[#allocation8 + $0x30] sm:$0xff]  ;;  %v308_v57 = vld [vmem:[#allocation8 + $0xa8] sm:$0xff]  ;;  %v307_v59 = vld [vmem:[#allocation8 + $0xa0] sm:$0xff] }
  0x48   :  { %231 = vmatpush1.msra.mxu1 %v184_v22  ;;  %446 = vmatpush3.msra.mxu0 %v299_v44  ;;  %v292_v58 = vld [vmem:[#allocation8 + $0x28] sm:$0xff]  ;;  %v291_v60 = vld [vmem:[#allocation8 + $0x20] sm:$0xff]  ;;  %v306_v2 = vld [vmem:[#allocation8 + $0x98] sm:$0xff] }
  0x49   :  { %232 = vmatprep.subr.mxu1 %v183_v23  ;;  %447 = vmatprep.subr.mxu0 %v314_v45  ;;  %v431_v61 = vld [vmem:[%s689_s2] ss:$0 sm:$0xff]  ;;  %v290_v3 = vld [vmem:[#allocation8 + $0x18] sm:$0xff]  ;;  %v305_v4 = vld [vmem:[#allocation8 + $0x90] sm:$0xff] }
  0x4a   :  { %233 = vmatpush1.msra.mxu1 %v182_v24  ;;  %448 = vmatpush3.msra.mxu0 %v298_v46  ;;  %v289_v5 = vld [vmem:[#allocation8 + $0x10] sm:$0xff]  ;;  %v304_v6 = vld [vmem:[#allocation8 + $0x88] sm:$0xff]  ;;  %v303_v8 = vld [vmem:[#allocation8 + $0x80] sm:$0xff] }
  0x4b   :  { %234 = vmatprep.subr.mxu1 %v181_v25  ;;  %449 = vmatprep.subr.mxu0 %v313_v47  ;;  %v288_v7 = vld [vmem:[#allocation8 + $0x8] sm:$0xff]  ;;  %v287_v9 = vld [vmem:[#allocation8] sm:$0xff] }
  0x4c   :  { %235 = vmatpush1.msra.mxu1 %v180_v26  ;;  %450 = vmatpush3.msra.mxu0 %v297_v48  ;;  %v202_v13 = vld [vmem:[%s691_s4] sm:$0x3]  ;;  %s616_s4 = smov [#allocation10]  }
  0x4d   :  { %236 = vmatprep.subr.mxu1 %v179_v27  ;;  %451 = vmatprep.subr.mxu0 %v312_v49  ;;  %v207_v15 = vrot.slane %v202_v13, %v206_v12  ;;  %v211_v16 = vrot.slane %v202_v13, %v210_v14  ;;  %v434_v24 = vld [vmem:[%s693_s6] ss:$0 sm:$0xff]  ;;  %s420_s6 = sshll.u32 %s616_s4, 4  ;;  %s421_s6 = int_to_ptr.vmem [resolvable:$true] %s420_s6 }
  0x4e   :  { %237 = vmatpush1.msra.mxu1 %v178_v28  ;;  %452 = vmatpush3.msra.mxu0 %v296_v50  ;;  %s578_s26 = scalar_lea.vmem %s421_s6, 128  ;;  %p583_p7 = scmp.lt.s32.totalorder %s421_s6, %s421_s6 }
  0x4f   :  { %238 = vmatprep.subr.mxu1 %v177_v29  ;;  %453 = vmatprep.subr.mxu0 %v311_v51  ;;  %p579_p6 = scmp.ne.s32.totalorder %s421_s6, %s578_s26  ;;  %p584_p8 = scmp.lt.s32.totalorder %s578_s26, %s578_s26 }
  0x50   :  { %239 = vmatpush1.msra.mxu1 %v176_v30  ;;  %454 = vmatpush3.msra.mxu0 %v295_v52 }
  0x51   :  { %240 = vmatprep.subr.mxu1 %v175_v31  ;;  %455 = vmatprep.subr.mxu0 %v310_v53  ;;  %p585_p9 = por %p584_p8, %p583_p7 }
  0x52   :  { %241 = vmatpush1.msra.mxu1 %v174_v32  ;;  %456 = vmatpush3.msra.mxu0 %v294_v54 }
  0x53   :  { %242 = vmatprep.subr.mxu1 %v173_v33  ;;  %457 = vmatprep.subr.mxu0 %v309_v55  ;;  %p586_p10 = pnand %p585_p9, %p579_p6 }
  0x54   :  { %243 = vmatpush1.msra.mxu1 %v172_v34  ;;  %458 = vmatpush3.msra.mxu0 %v293_v56 }
  0x55   :  { %244 = vmatprep.subr.mxu1 %v171_v35  ;;  %459 = vmatprep.subr.mxu0 %v308_v57 }
  0x56   :  { %245 = vmatpush1.msra.mxu1 %v170_v36  ;;  %460 = vmatpush3.msra.mxu0 %v292_v58 }
  0x57   :  { %461 = vmatprep.subr.mxu0 %v307_v59 }
  0x58   :  { %462 = vmatpush3.msra.mxu0 %v291_v60 }
  0x59   :  { %463 = vmatprep.subr.mxu0 %v306_v2 }
  0x5a   :  { %464 = vmatpush3.msra.mxu0 %v290_v3 }
  0x5b   :  { %465 = vmatprep.subr.mxu0 %v305_v4 }
  0x5c   :  { %466 = vmatpush3.msra.mxu0 %v289_v5 }
  0x5d   :  { %467 = vmatprep.subr.mxu0 %v304_v6 }
  0x5e   :  { %468 = vmatpush3.msra.mxu0 %v288_v7 }
  0x5f   :  { %469 = vmatprep.subr.mxu0 %v303_v8 }
  0x60   :  { %470 = vmatpush3.msra.mxu0 %v287_v9 }
  0xfb   :  { %v165_v62 = vpop.f32.mrf.mxu0 }
  0xfc   :  { %v166_v63 = vadd.f32 %v431_v61, %v165_v62 }
  0xfd   :  { %v482_v0 = vpop.f32.mrf.mxu0 }
  0xfe   :  { %v169_v1 = vmax.f32 %v166_v63, 0.0 }
 0x100   :  { %279 = vmatmul.mubr.f32.vlgmr.msra.gmra.mxu1 %v169_v1 }
 0x1c0   :  { %v280_v17 = vpop.f32.mrf.mxu1 }
 0x1c1   :  { %v281_v18 = vadd.f32 %v280_v17, %v207_v15 }
 0x1c2   :  { %v282_v19 = vpop.f32.mrf.mxu1 }
 0x1c3   :  { %v283_v20 = vadd.f32 %v282_v19, %v211_v16  ;;  %v285_v22 = vmax.f32 %v281_v18, 0.0 }
 0x1c5   :  { %v286_v21 = vmax.f32 %v283_v20, 0.0 }
 0x1c7   :  { %390 = vmatprep.mubr.f32.mxu0 %v286_v21 }
 0x1c8   :  { %391 = vmatmul.mubr.f32.vlgmr.msra.gmra.mxu0 %v285_v22 }
 0x288   :  { %v471_v23 = vpop.f32.mrf.mxu0 }
 0x28a   :  { %v472_v25 = vpop.f32.mrf.mxu0 }
 0x28b   :  { %v473_v26 = vadd.f32 %v472_v25, %v471_v23 }
 0x28d   :  { %v393_v27 = vadd.f32 %v473_v26, %v434_v24 }
 0x28f   :  { %v396_v28 = vrot.slane %v393_v27, 4 }
 0x291   :  { %v397_v29 = vmax.f32 %v393_v27, %v396_v28 }
 0x293   :  { %v398_v30 = vrot.slane %v397_v29, 2 }
 0x295   :  { %v399_v31 = vmax.f32 %v397_v29, %v398_v30 }
 0x297   :  { %v400_v32 = vrot.slane %v399_v31, 1 }
 0x299   :  { %v401_v33 = vmax.f32 %v399_v31, %v400_v32 }
 0x29b   :  { %v402_v34 = vsub.f32 %v393_v27, %v401_v33 }
 0x29d   :  { %v403_v35 = vmul.f32 1.442695, %v402_v34 }
 0x29f   :  { %494 = vpow2.f32 %v403_v35 }
 0x2ac   :  { %v495_v36 = vpop.eup %494 }
 0x2ad   :  { %v405_v37 = vrot.slane %v495_v36, 4 }
 0x2af   :  { %v406_v38 = vadd.f32 %v495_v36, %v405_v37 }
 0x2b1   :  { %v407_v39 = vrot.slane %v406_v38, 2 }
 0x2b3   :  { %v408_v40 = vadd.f32 %v407_v39, %v406_v38 }
 0x2b5   :  { %v409_v41 = vrot.slane %v408_v40, 1 }
 0x2b7   :  { %v410_v42 = vadd.f32 %v409_v41, %v408_v40 }
 0x2b9   :  { %496 = vrcp.f32 %v410_v42 }
 0x2c6   :  { %v497_v43 = vpop.eup %496 }
 0x2c7   :  { %v412_v44 = vmul.f32 %v497_v43, %v495_v36 }
 0x2c9   :  { %413 = vst [vmem:[#allocation10] sm:$0xff] %v412_v44 }
 0x2ca   :  { %589 = shalt.err (!%p586_p10)
}
 0x2cb   :  { %423 = dma.vmem_to_hbm [thread:$0]  %s421_s6, 128, %s694_s7, [#allocation4]  }
 0x2cc   :  { %604 = dma.done.wait [#allocation4], 128  }
 0x2cd   :  { %605 = vsyncadd [#allocation4], 4294967168 }
 0x2ce   :  { %427 = vsyncpa [#allocation3], 1 }
 0x2cf   :  { %428 = vsyncpa [#allocation6], 1 }
 0x2d0   :  { %429 = vsyncpa [#allocation9], 1 }
 0x2d1   :  { %430 = vsyncpa [#allocation4], 1 }

</bundles_post_ra>
